<compile_context>
chip_gen: v6e
topology: v6e:2x2x1
jax: 0.10.0
libtpu: 0.0.40
codegen_flags: <defaults>
</compile_context>

<pallas_src>
import jax
import jax.numpy as jnp
from jax.experimental import pallas as pl
from jax.experimental.pallas import tpu as pltpu

SMOOTH_NR = 1e-5  # MONAI DiceLoss default smooth (numerator)
SMOOTH_DR = 1e-5  # MONAI DiceLoss default smooth (denominator)

_LANE = 128
_SUBLANE_QUANT = 32                     # S_tile multiple of 32: native tiling for f32/bf16/int8
_MIN_TILE_PIXELS = _SUBLANE_QUANT * _LANE
_MAX_TILE_PIXELS = 256 * 1024           # large tiles amortize ~0.35us/step overhead (v6e/v7x)
_VMEM_STEP_TARGET = 24 * 1024 * 1024    # per-step inputs (x2 buffers) + f32 temporaries


def _make_dice_ce_kernel(C, s_tile):
    G = s_tile // 8

    def kernel(logits_ref, labels_ref, inter_ref, pred_ref, gt_ref, ce_ref):
        p = pl.program_id(2)

        # Fresh (batch, chunk): zero the resident accumulator blocks.  They stay in VMEM
        # across the whole pixel-tile sweep and are written back to HBM once.
        @pl.when(p == 0)
        def _():
            inter_ref[...] = jnp.zeros_like(inter_ref)
            pred_ref[...] = jnp.zeros_like(pred_ref)
            gt_ref[...] = jnp.zeros_like(gt_ref)
            ce_ref[...] = jnp.zeros_like(ce_ref)

        # HBM traffic stays in the native dtypes (bf16 logits / int8 labels); upcast
        # happens in-register.
        logits = logits_ref[0].astype(jnp.float32)        # (C, S, 128)
        labels = labels_ref[0].astype(jnp.int32)          # (S, 128)

        cls_idx = jax.lax.broadcasted_iota(jnp.int32, (C, s_tile, _LANE), 0)
        sel = cls_idx == labels[None]                     # (C, S, 128) one-hot mask
        # Padded pixels carry the sentinel label C -> sel is all-False for them, so they
        # only contribute 1/C to pred_o and log(C) to CE (corrected exactly in the wrapper).
        # TODO(synk): labels outside [0, C) other than the padding sentinel (e.g. an
        # ignore_index) follow the same path as the original module's happy path.

        # Numerically-stable softmax over the class (major) axis: C-1 dense VPU max/adds;
        # the divide runs on the EUP via an exact reciprocal.
        m = jnp.max(logits, axis=0, keepdims=True)        # (1, S, 128)
        e = jnp.exp(logits - m)                           # (C, S, 128)
        s = jnp.sum(e, axis=0, keepdims=True)             # (1, S, 128)
        probs = e * pl.reciprocal(s)                      # (C, S, 128)  (exact recip)

        # Fold only across sublane groups (pure vreg adds): partial sums keep the dense
        # (8, 128) shape; the final cross-lane reduce happens once in the wrapper.
        def fold_c(x):                                    # (C, S, 128) -> (C, 8, 128)
            return jnp.sum(x.reshape(C, G, 8, _LANE), axis=1)

        inter_ref[0] += fold_c(jnp.where(sel, probs, 0.0))
        pred_ref[0] += fold_c(probs)
        gt_ref[0] += fold_c(jnp.where(sel, 1.0, 0.0))

        # Per-pixel cross entropy in the stable lse - logit[true] form (no -log underflow).
        lse = m + jnp.log(s)                                                    # (1, S, 128)
        logit_true = jnp.sum(jnp.where(sel, logits, 0.0), axis=0, keepdims=True)
        ce_px = lse - logit_true                                                # (1, S, 128)
        ce_ref[0] += jnp.sum(ce_px.reshape(G, 8, _LANE), axis=0)                # (8, 128)

    return kernel


def _round_up(x, m):
    return -(-x // m) * m


def _plan_tiles(P, C, logit_itemsize, label_itemsize, tile_pixels, n_chunks):
    """Pick (s_tile rows, pixel tiles per chunk, n_chunks, padded row count)."""
    s_total = -(-P // _LANE)                                  # 128-pixel rows needed
    if tile_pixels is None:
        # Per-pixel bytes alive during one grid step: double-buffered inputs plus ~5
        # C-channel f32 temporaries (upcast logits, exp, probs, masked selects).
        per_px = 2 * (C * logit_itemsize + label_itemsize) + 5 * C * 4
        budget_px = max(_MIN_TILE_PIXELS,
                        min(_MAX_TILE_PIXELS, _VMEM_STEP_TARGET // per_px))
    else:
        assert tile_pixels % _MIN_TILE_PIXELS == 0, \
            "tile_pixels must be a multiple of 4096 (32 sublanes x 128 lanes)"
        budget_px = tile_pixels
    s_budget = max(_SUBLANE_QUANT,
                   (budget_px // _LANE) // _SUBLANE_QUANT * _SUBLANE_QUANT)

    total_tiles = -(-s_total // s_budget)
    if n_chunks is None:
        # Second 'parallel' grid axis so both v7x TensorCores get work even at N=1
        # (no-op on single-core v5e/v6e).
        n_chunks = 2 if total_tiles >= 2 else 1
    tiles_per_chunk = max(1, -(-s_total // (n_chunks * s_budget)))
    s_tile = _round_up(-(-s_total // (n_chunks * tiles_per_chunk)), _SUBLANE_QUANT)
    s_padded = s_tile * tiles_per_chunk * n_chunks
    return s_tile, tiles_per_chunk, n_chunks, s_padded


def dice_ce_loss(y_pred, y_true, *, tile_pixels=None, n_chunks=None):
    """y_pred: (N, C, H, W) float logits (f32 or bf16); y_true: (N, 1, H, W) int labels."""
    N, C, H, W = y_pred.shape
    P = H * W

    label_dtype = jnp.int8 if C <= 127 else jnp.int32
    s_tile, ppc, n_chunks, s_padded = _plan_tiles(
        P, C, jnp.dtype(y_pred.dtype).itemsize, jnp.dtype(label_dtype).itemsize,
        tile_pixels, n_chunks)
    p_padded = s_padded * _LANE
    n_pad = p_padded - P

    # Flatten spatial dims and pad to the tile grid.  Padded pixels use zero logits and
    # the sentinel label C; their exact contributions are removed analytically below, so
    # the kernel hot loop carries no tail mask.
    logits = y_pred.reshape(N, C, P)
    labels = y_true.reshape(N, P).astype(jnp.int32)
    if n_pad:
        logits = jnp.pad(logits, ((0, 0), (0, 0), (0, n_pad)))
        labels = jnp.pad(labels, ((0, 0), (0, n_pad)), constant_values=C)
    logits = logits.reshape(N, C, s_padded, _LANE)                  # native dtype in HBM
    labels = labels.astype(label_dtype).reshape(N, s_padded, _LANE)

    # Explicit VMEM budget: double-buffered inputs + f32 temporaries + resident
    # accumulator blocks, with headroom.  Stays under every chip's physical VMEM
    # (v7x: 64 MiB) while overriding v5e's 16 MiB scoped default when needed.
    tile_px = s_tile * _LANE
    step_bytes = (2 * tile_px * (C * logits.dtype.itemsize + labels.dtype.itemsize)
                  + 5 * C * tile_px * 4
                  + 2 * (3 * C + 1) * 8 * _LANE * 4)
    vmem_limit = int(min(max(step_bytes * 1.5 + (2 << 20), 16 << 20), 56 << 20))

    kernel = _make_dice_ce_kernel(C, s_tile)
    inter, pred_o, gt_o, ce_part = pl.pallas_call(
        kernel,
        out_shape=(
            jax.ShapeDtypeStruct((N * n_chunks, C, 8, _LANE), jnp.float32),
            jax.ShapeDtypeStruct((N * n_chunks, C, 8, _LANE), jnp.float32),
            jax.ShapeDtypeStruct((N * n_chunks, C, 8, _LANE), jnp.float32),
            jax.ShapeDtypeStruct((N * n_chunks, 8, _LANE), jnp.float32),
        ),
        grid_spec=pltpu.PrefetchScalarGridSpec(
            num_scalar_prefetch=0,
            grid=(N, n_chunks, ppc),                 # reduction (pixel-tile) axis last
            in_specs=[
                pl.BlockSpec((1, C, s_tile, _LANE),
                             lambda n, ck, p: (n, 0, ck * ppc + p, 0)),
                pl.BlockSpec((1, s_tile, _LANE),
                             lambda n, ck, p: (n, ck * ppc + p, 0)),
            ],
            out_specs=[
                # Block index independent of p -> resident VMEM accumulator per
                # (batch, chunk); a single small HBM writeback per chunk.
                pl.BlockSpec((1, C, 8, _LANE), lambda n, ck, p: (n * n_chunks + ck, 0, 0, 0)),
                pl.BlockSpec((1, C, 8, _LANE), lambda n, ck, p: (n * n_chunks + ck, 0, 0, 0)),
                pl.BlockSpec((1, C, 8, _LANE), lambda n, ck, p: (n * n_chunks + ck, 0, 0, 0)),
                pl.BlockSpec((1, 8, _LANE), lambda n, ck, p: (n * n_chunks + ck, 0, 0)),
            ],
        ),
        compiler_params=pltpu.CompilerParams(
            dimension_semantics=("parallel", "parallel", "arbitrary"),
            vmem_limit_bytes=vmem_limit),
    )(logits, labels)

    # Tiny cross-chunk / cross-lane reductions plus the exact padding corrections.
    inter = inter.reshape(N, n_chunks, C, 8 * _LANE).sum(axis=(1, 3))                 # (N, C)
    pred_o = pred_o.reshape(N, n_chunks, C, 8 * _LANE).sum(axis=(1, 3)) - n_pad / C   # pad: 1/C each
    gt_o = gt_o.reshape(N, n_chunks, C, 8 * _LANE).sum(axis=(1, 3))                   # (N, C)
    ce_sum = (ce_part.reshape(N, -1).sum(axis=1)
              - jnp.float32(n_pad) * jnp.log(jnp.float32(C)))                         # pad: log(C) each

    # MONAI DiceLoss: per-(batch, class) dice, mean reduction (include_background=True).
    dice = jnp.mean(1.0 - (2.0 * inter + SMOOTH_NR) / (gt_o + pred_o + SMOOTH_DR))
    # nn.CrossEntropyLoss default reduction='mean' over the N*H*W real pixels.
    ce = jnp.sum(ce_sum) / (N * P)
    return dice + 10.0 * ce


def _reference_loss(y_pred, y_true):
    """Pure-JAX reference of the PyTorch forward (for a sanity check)."""
    N, C, H, W = y_pred.shape
    lab = y_true[:, 0].astype(jnp.int32)                 # (N, H, W)
    onehot = jax.nn.one_hot(lab, C, axis=1)              # (N, C, H, W)
    probs = jax.nn.softmax(y_pred.astype(jnp.float32), axis=1)
    inter = jnp.sum(probs * onehot, axis=(2, 3))
    pred_o = jnp.sum(probs, axis=(2, 3))
    gt_o = jnp.sum(onehot, axis=(2, 3))
    dice = jnp.mean(1.0 - (2.0 * inter + SMOOTH_NR) / (gt_o + pred_o + SMOOTH_DR))
    logp = jax.nn.log_softmax(y_pred.astype(jnp.float32), axis=1)
    ce = -jnp.mean(jnp.sum(onehot * logp, axis=1))
    return dice + 10.0 * ce


if __name__ == "__main__":
    key = jax.random.PRNGKey(0)

    def _check(N, C, H, W, **kw):
        k = jax.random.fold_in(key, N * 131071 + C * 8191 + H * 127 + W)
        k_logits, k_labels = jax.random.split(k)
        y_pred = jax.random.normal(k_logits, (N, C, H, W), dtype=jnp.float32)
        y_true = jax.random.randint(k_labels, (N, 1, H, W), 0, C, dtype=jnp.int32)
        got = jax.block_until_ready(dice_ce_loss(y_pred, y_true, **kw))
        ref = jax.block_until_ready(_reference_loss(y_pred, y_true))
        assert jnp.allclose(got, ref, rtol=1e-4, atol=1e-4), (N, C, H, W, kw, got, ref)

    _check(2, 4, 16, 16)                                    # single tile, padding correction path
    _check(2, 4, 128, 128, tile_pixels=4096, n_chunks=2)    # multi-tile accumulators + 2 chunks, no pad
    _check(1, 4, 100, 100, tile_pixels=4096, n_chunks=2)    # ragged P: padding + chunks + multi-tile
    print("KERNEL_OK")
</pallas_src>

<mosaic_0001>
module attributes {stable_mosaic.version = 11 : i64} {
  func.func @kernel(%arg0: i32, %arg1: i32, %arg2: i32, %arg3: memref<1x4x32x128xf32, #tpu.memory_space<vmem>>, %arg4: memref<1x32x128xi8, #tpu.memory_space<vmem>>, %arg5: memref<1x4x8x128xf32, #tpu.memory_space<vmem>>, %arg6: memref<1x4x8x128xf32, #tpu.memory_space<vmem>>, %arg7: memref<1x4x8x128xf32, #tpu.memory_space<vmem>>, %arg8: memref<1x8x128xf32, #tpu.memory_space<vmem>>) attributes {dimension_semantics = [#tpu.dimension_semantics<parallel>, #tpu.dimension_semantics<parallel>, #tpu.dimension_semantics<arbitrary>], iteration_bounds = array<i64: 2, 1, 1>, scalar_prefetch = 0 : i64, scratch_operands = 0 : i64, tpu.core_type = #tpu.core_type<tc>, window_params = [{transform_indices = @transform_0, window_bounds = array<i64: 1, 4, 32, 128>}, {transform_indices = @transform_1, window_bounds = array<i64: 1, 32, 128>}, {transform_indices = @transform_2, window_bounds = array<i64: 1, 4, 8, 128>}, {transform_indices = @transform_3, window_bounds = array<i64: 1, 4, 8, 128>}, {transform_indices = @transform_4, window_bounds = array<i64: 1, 4, 8, 128>}, {transform_indices = @transform_5, window_bounds = array<i64: 1, 8, 128>}]} {
    %c0_i32 = arith.constant 0 : i32
    %0 = arith.cmpi eq, %arg2, %c0_i32 : i32
    %1 = arith.extui %0 : i1 to i32
    %c0_i32_0 = arith.constant 0 : i32
    %2 = arith.cmpi ne, %1, %c0_i32_0 : i32
    scf.if %2 {
      %cst_47 = arith.constant 0.000000e+00 : f32
      %66 = vector.broadcast %cst_47 : f32 to vector<1x4x8x128xf32>
      %c0_48 = arith.constant 0 : index
      %c0_49 = arith.constant 0 : index
      %c0_50 = arith.constant 0 : index
      %c0_51 = arith.constant 0 : index
      %67 = vector.load %arg5[%c0_48, %c0_49, %c0_50, %c0_51] : memref<1x4x8x128xf32, #tpu.memory_space<vmem>>, vector<1x4x8x128xf32>
      tpu.vector_store %arg5[%c0_48, %c0_49, %c0_50, %c0_51], %66 {strides = array<i32>} : memref<1x4x8x128xf32, #tpu.memory_space<vmem>>, vector<1x4x8x128xf32>,
      %cst_52 = arith.constant 0.000000e+00 : f32
      %68 = vector.broadcast %cst_52 : f32 to vector<1x4x8x128xf32>
      %c0_53 = arith.constant 0 : index
      %c0_54 = arith.constant 0 : index
      %c0_55 = arith.constant 0 : index
      %c0_56 = arith.constant 0 : index
      %69 = vector.load %arg6[%c0_53, %c0_54, %c0_55, %c0_56] : memref<1x4x8x128xf32, #tpu.memory_space<vmem>>, vector<1x4x8x128xf32>
      tpu.vector_store %arg6[%c0_53, %c0_54, %c0_55, %c0_56], %68 {strides = array<i32>} : memref<1x4x8x128xf32, #tpu.memory_space<vmem>>, vector<1x4x8x128xf32>,
      %cst_57 = arith.constant 0.000000e+00 : f32
      %70 = vector.broadcast %cst_57 : f32 to vector<1x4x8x128xf32>
      %c0_58 = arith.constant 0 : index
      %c0_59 = arith.constant 0 : index
      %c0_60 = arith.constant 0 : index
      %c0_61 = arith.constant 0 : index
      %71 = vector.load %arg7[%c0_58, %c0_59, %c0_60, %c0_61] : memref<1x4x8x128xf32, #tpu.memory_space<vmem>>, vector<1x4x8x128xf32>
      tpu.vector_store %arg7[%c0_58, %c0_59, %c0_60, %c0_61], %70 {strides = array<i32>} : memref<1x4x8x128xf32, #tpu.memory_space<vmem>>, vector<1x4x8x128xf32>,
      %cst_62 = arith.constant 0.000000e+00 : f32
      %72 = vector.broadcast %cst_62 : f32 to vector<1x8x128xf32>
      %c0_63 = arith.constant 0 : index
      %c0_64 = arith.constant 0 : index
      %c0_65 = arith.constant 0 : index
      %73 = vector.load %arg8[%c0_63, %c0_64, %c0_65] : memref<1x8x128xf32, #tpu.memory_space<vmem>>, vector<1x8x128xf32>
      tpu.vector_store %arg8[%c0_63, %c0_64, %c0_65], %72 {strides = array<i32>} : memref<1x8x128xf32, #tpu.memory_space<vmem>>, vector<1x8x128xf32>,
    } else {
    }
    %c0 = arith.constant 0 : index
    %c0_1 = arith.constant 0 : index
    %c0_2 = arith.constant 0 : index
    %c0_3 = arith.constant 0 : index
    %3 = vector.load %arg3[%c0, %c0_1, %c0_2, %c0_3] : memref<1x4x32x128xf32, #tpu.memory_space<vmem>>, vector<1x4x32x128xf32>
    %4 = vector.shape_cast %3 : vector<1x4x32x128xf32> to vector<4x32x128xf32>
    %c0_4 = arith.constant 0 : index
    %c0_5 = arith.constant 0 : index
    %c0_6 = arith.constant 0 : index
    %5 = vector.load %arg4[%c0_4, %c0_5, %c0_6] : memref<1x32x128xi8, #tpu.memory_space<vmem>>, vector<1x32x128xi8>
    %6 = vector.shape_cast %5 : vector<1x32x128xi8> to vector<32x128xi8>
    %7 = arith.extsi %6 : vector<32x128xi8> to vector<32x128xi32>
    %8 = tpu.iota {dimensions = array<i32: 0>} : vector<4x32x128xi32>
    %9 = vector.shape_cast %7 : vector<32x128xi32> to vector<1x32x128xi32>
    %10 = vector.broadcast %9 : vector<1x32x128xi32> to vector<4x32x128xi32>
    %11 = arith.cmpi eq, %8, %10 : vector<4x32x128xi32>
    %cst = arith.constant dense<0xFF800000> : vector<32x128xf32>
    %12 = vector.multi_reduction <maximumf>, %4, %cst [0] : vector<4x32x128xf32> to vector<32x128xf32>
    %13 = vector.shape_cast %12 : vector<32x128xf32> to vector<1x32x128xf32>
    %14 = vector.broadcast %13 : vector<1x32x128xf32> to vector<4x32x128xf32>
    %15 = arith.subf %4, %14 : vector<4x32x128xf32>
    %16 = math.exp %15 : vector<4x32x128xf32>
    %cst_7 = arith.constant dense<0.000000e+00> : vector<32x128xf32>
    %17 = vector.multi_reduction <add>, %16, %cst_7 [0] : vector<4x32x128xf32> to vector<32x128xf32>
    %18 = vector.shape_cast %17 : vector<32x128xf32> to vector<1x32x128xf32>
    %19 = tpu.reciprocal %18 : vector<1x32x128xf32> -> vector<1x32x128xf32>
    %20 = vector.broadcast %19 : vector<1x32x128xf32> to vector<4x32x128xf32>
    %21 = arith.mulf %16, %20 : vector<4x32x128xf32>
    %c0_8 = arith.constant 0 : index
    %c0_9 = arith.constant 0 : index
    %c0_10 = arith.constant 0 : index
    %c0_11 = arith.constant 0 : index
    %22 = vector.load %arg5[%c0_8, %c0_9, %c0_10, %c0_11] : memref<1x4x8x128xf32, #tpu.memory_space<vmem>>, vector<1x4x8x128xf32>
    %23 = vector.shape_cast %22 : vector<1x4x8x128xf32> to vector<4x8x128xf32>
    %cst_12 = arith.constant 0.000000e+00 : f32
    %24 = vector.broadcast %cst_12 : f32 to vector<4x32x128xf32>
    %25 = arith.select %11, %21, %24 : vector<4x32x128xi1>, vector<4x32x128xf32>
    %26 = vector.shape_cast %25 : vector<4x32x128xf32> to vector<4x4x8x128xf32>
    %cst_13 = arith.constant dense<0.000000e+00> : vector<4x8x128xf32>
    %27 = vector.multi_reduction <add>, %26, %cst_13 [1] : vector<4x4x8x128xf32> to vector<4x8x128xf32>
    %28 = arith.addf %23, %27 : vector<4x8x128xf32>
    %c0_14 = arith.constant 0 : index
    %c0_15 = arith.constant 0 : index
    %c0_16 = arith.constant 0 : index
    %c0_17 = arith.constant 0 : index
    %29 = vector.load %arg5[%c0_14, %c0_15, %c0_16, %c0_17] : memref<1x4x8x128xf32, #tpu.memory_space<vmem>>, vector<1x4x8x128xf32>
    %30 = vector.shape_cast %29 : vector<1x4x8x128xf32> to vector<4x8x128xf32>
    %31 = vector.shape_cast %28 : vector<4x8x128xf32> to vector<1x4x8x128xf32>
    tpu.vector_store %arg5[%c0_14, %c0_15, %c0_16, %c0_17], %31 {strides = array<i32>} : memref<1x4x8x128xf32, #tpu.memory_space<vmem>>, vector<1x4x8x128xf32>,
    %c0_18 = arith.constant 0 : index
    %c0_19 = arith.constant 0 : index
    %c0_20 = arith.constant 0 : index
    %c0_21 = arith.constant 0 : index
    %32 = vector.load %arg6[%c0_18, %c0_19, %c0_20, %c0_21] : memref<1x4x8x128xf32, #tpu.memory_space<vmem>>, vector<1x4x8x128xf32>
    %33 = vector.shape_cast %32 : vector<1x4x8x128xf32> to vector<4x8x128xf32>
    %34 = vector.shape_cast %21 : vector<4x32x128xf32> to vector<4x4x8x128xf32>
    %cst_22 = arith.constant dense<0.000000e+00> : vector<4x8x128xf32>
    %35 = vector.multi_reduction <add>, %34, %cst_22 [1] : vector<4x4x8x128xf32> to vector<4x8x128xf32>
    %36 = arith.addf %33, %35 : vector<4x8x128xf32>
    %c0_23 = arith.constant 0 : index
    %c0_24 = arith.constant 0 : index
    %c0_25 = arith.constant 0 : index
    %c0_26 = arith.constant 0 : index
    %37 = vector.load %arg6[%c0_23, %c0_24, %c0_25, %c0_26] : memref<1x4x8x128xf32, #tpu.memory_space<vmem>>, vector<1x4x8x128xf32>
    %38 = vector.shape_cast %37 : vector<1x4x8x128xf32> to vector<4x8x128xf32>
    %39 = vector.shape_cast %36 : vector<4x8x128xf32> to vector<1x4x8x128xf32>
    tpu.vector_store %arg6[%c0_23, %c0_24, %c0_25, %c0_26], %39 {strides = array<i32>} : memref<1x4x8x128xf32, #tpu.memory_space<vmem>>, vector<1x4x8x128xf32>,
    %c0_27 = arith.constant 0 : index
    %c0_28 = arith.constant 0 : index
    %c0_29 = arith.constant 0 : index
    %c0_30 = arith.constant 0 : index
    %40 = vector.load %arg7[%c0_27, %c0_28, %c0_29, %c0_30] : memref<1x4x8x128xf32, #tpu.memory_space<vmem>>, vector<1x4x8x128xf32>
    %41 = vector.shape_cast %40 : vector<1x4x8x128xf32> to vector<4x8x128xf32>
    %cst_31 = arith.constant 1.000000e+00 : f32
    %cst_32 = arith.constant 0.000000e+00 : f32
    %42 = vector.broadcast %cst_31 : f32 to vector<4x32x128xf32>
    %43 = vector.broadcast %cst_32 : f32 to vector<4x32x128xf32>
    %44 = arith.select %11, %42, %43 : vector<4x32x128xi1>, vector<4x32x128xf32>
    %45 = vector.shape_cast %44 : vector<4x32x128xf32> to vector<4x4x8x128xf32>
    %cst_33 = arith.constant dense<0.000000e+00> : vector<4x8x128xf32>
    %46 = vector.multi_reduction <add>, %45, %cst_33 [1] : vector<4x4x8x128xf32> to vector<4x8x128xf32>
    %47 = arith.addf %41, %46 : vector<4x8x128xf32>
    %c0_34 = arith.constant 0 : index
    %c0_35 = arith.constant 0 : index
    %c0_36 = arith.constant 0 : index
    %c0_37 = arith.constant 0 : index
    %48 = vector.load %arg7[%c0_34, %c0_35, %c0_36, %c0_37] : memref<1x4x8x128xf32, #tpu.memory_space<vmem>>, vector<1x4x8x128xf32>
    %49 = vector.shape_cast %48 : vector<1x4x8x128xf32> to vector<4x8x128xf32>
    %50 = vector.shape_cast %47 : vector<4x8x128xf32> to vector<1x4x8x128xf32>
    tpu.vector_store %arg7[%c0_34, %c0_35, %c0_36, %c0_37], %50 {strides = array<i32>} : memref<1x4x8x128xf32, #tpu.memory_space<vmem>>, vector<1x4x8x128xf32>,
    %51 = math.log %18 : vector<1x32x128xf32>
    %52 = arith.addf %13, %51 : vector<1x32x128xf32>
    %cst_38 = arith.constant 0.000000e+00 : f32
    %53 = vector.broadcast %cst_38 : f32 to vector<4x32x128xf32>
    %54 = arith.select %11, %4, %53 : vector<4x32x128xi1>, vector<4x32x128xf32>
    %cst_39 = arith.constant dense<0.000000e+00> : vector<32x128xf32>
    %55 = vector.multi_reduction <add>, %54, %cst_39 [0] : vector<4x32x128xf32> to vector<32x128xf32>
    %56 = vector.shape_cast %55 : vector<32x128xf32> to vector<1x32x128xf32>
    %57 = arith.subf %52, %56 : vector<1x32x128xf32>
    %c0_40 = arith.constant 0 : index
    %c0_41 = arith.constant 0 : index
    %c0_42 = arith.constant 0 : index
    %58 = vector.load %arg8[%c0_40, %c0_41, %c0_42] : memref<1x8x128xf32, #tpu.memory_space<vmem>>, vector<1x8x128xf32>
    %59 = vector.shape_cast %58 : vector<1x8x128xf32> to vector<8x128xf32>
    %60 = vector.shape_cast %57 : vector<1x32x128xf32> to vector<4x8x128xf32>
    %cst_43 = arith.constant dense<0.000000e+00> : vector<8x128xf32>
    %61 = vector.multi_reduction <add>, %60, %cst_43 [0] : vector<4x8x128xf32> to vector<8x128xf32>
    %62 = arith.addf %59, %61 : vector<8x128xf32>
    %c0_44 = arith.constant 0 : index
    %c0_45 = arith.constant 0 : index
    %c0_46 = arith.constant 0 : index
    %63 = vector.load %arg8[%c0_44, %c0_45, %c0_46] : memref<1x8x128xf32, #tpu.memory_space<vmem>>, vector<1x8x128xf32>
    %64 = vector.shape_cast %63 : vector<1x8x128xf32> to vector<8x128xf32>
    %65 = vector.shape_cast %62 : vector<8x128xf32> to vector<1x8x128xf32>
    tpu.vector_store %arg8[%c0_44, %c0_45, %c0_46], %65 {strides = array<i32>} : memref<1x8x128xf32, #tpu.memory_space<vmem>>, vector<1x8x128xf32>,
    return
  }
  func.func @transform_0(%arg0: i32, %arg1: i32, %arg2: i32) -> (i32, i32, i32, i32) {
    %c1_i32 = arith.constant 1 : i32
    %0 = arith.muli %arg1, %c1_i32 : i32
    %1 = arith.addi %0, %arg2 : i32
    %c0_i32 = arith.constant 0 : i32
    %c0_i32_0 = arith.constant 0 : i32
    %c0_i32_1 = arith.constant 0 : i32
    return %arg0, %c0_i32, %1, %c0_i32_0 : i32, i32, i32, i32
  }
  func.func @transform_1(%arg0: i32, %arg1: i32, %arg2: i32) -> (i32, i32, i32) {
    %c1_i32 = arith.constant 1 : i32
    %0 = arith.muli %arg1, %c1_i32 : i32
    %1 = arith.addi %0, %arg2 : i32
    %c0_i32 = arith.constant 0 : i32
    %c0_i32_0 = arith.constant 0 : i32
    return %arg0, %1, %c0_i32 : i32, i32, i32
  }
  func.func @transform_2(%arg0: i32, %arg1: i32, %arg2: i32) -> (i32, i32, i32, i32) {
    %c1_i32 = arith.constant 1 : i32
    %0 = arith.muli %arg0, %c1_i32 : i32
    %1 = arith.addi %0, %arg1 : i32
    %c0_i32 = arith.constant 0 : i32
    %c0_i32_0 = arith.constant 0 : i32
    %c0_i32_1 = arith.constant 0 : i32
    %c0_i32_2 = arith.constant 0 : i32
    return %1, %c0_i32, %c0_i32_0, %c0_i32_1 : i32, i32, i32, i32
  }
  func.func @transform_3(%arg0: i32, %arg1: i32, %arg2: i32) -> (i32, i32, i32, i32) {
    %c1_i32 = arith.constant 1 : i32
    %0 = arith.muli %arg0, %c1_i32 : i32
    %1 = arith.addi %0, %arg1 : i32
    %c0_i32 = arith.constant 0 : i32
    %c0_i32_0 = arith.constant 0 : i32
    %c0_i32_1 = arith.constant 0 : i32
    %c0_i32_2 = arith.constant 0 : i32
    return %1, %c0_i32, %c0_i32_0, %c0_i32_1 : i32, i32, i32, i32
  }
  func.func @transform_4(%arg0: i32, %arg1: i32, %arg2: i32) -> (i32, i32, i32, i32) {
    %c1_i32 = arith.constant 1 : i32
    %0 = arith.muli %arg0, %c1_i32 : i32
    %1 = arith.addi %0, %arg1 : i32
    %c0_i32 = arith.constant 0 : i32
    %c0_i32_0 = arith.constant 0 : i32
    %c0_i32_1 = arith.constant 0 : i32
    %c0_i32_2 = arith.constant 0 : i32
    return %1, %c0_i32, %c0_i32_0, %c0_i32_1 : i32, i32, i32, i32
  }
  func.func @transform_5(%arg0: i32, %arg1: i32, %arg2: i32) -> (i32, i32, i32) {
    %c1_i32 = arith.constant 1 : i32
    %0 = arith.muli %arg0, %c1_i32 : i32
    %1 = arith.addi %0, %arg1 : i32
    %c0_i32 = arith.constant 0 : i32
    %c0_i32_0 = arith.constant 0 : i32
    %c0_i32_1 = arith.constant 0 : i32
    return %1, %c0_i32, %c0_i32_0 : i32, i32, i32
  }
}

</mosaic_0001>

<bundles_post_ra>
// kernel: tpu_custom_call.1
= control target key start
LH: loop header
LB: loop body
LE: loop exit
PB: predicated region body
PF: predicated region fallthrough
CT: control target
= control target key end

     0   :  { %s1980_s0 = inlined_call_operand.hbm [shape: f32[2,4,32,128], index: 0, kind: input, shape index: {}]   ;;  %s1981_s1 = inlined_call_operand.hbm [shape: s8[2,32,128], index: 1, kind: input, shape index: {}]   ;;  %s1982_s2 = inlined_call_operand.hbm [shape: f32[2,4,8,128], index: 2, kind: output, shape index: {0}]   ;;  %s1983_s3 = inlined_call_operand.hbm [shape: f32[2,4,8,128], index: 3, kind: output, shape index: {1}]   ;;  %s1984_s4 = inlined_call_operand.hbm [shape: f32[2,4,8,128], index: 4, kind: output, shape index: {2}]   ;;  %s1985_s5 = inlined_call_operand.hbm [shape: f32[2,8,128], index: 5, kind: output, shape index: {3}]  }
   0x1   :  { %1989 = sst [smem:[#allocation21_spill]] %s1980_s0 }
   0x2   :  { %11 = vsyncpa [#allocation3], 0 }
   0x3   :  { %13 = vsyncpa [#allocation3 + $0x1], 0 }
   0x4   :  { %14 = vsyncpa [#allocation6], 0 }
   0x5   :  { %16 = vsyncpa [#allocation6 + $0x1], 0 }
   0x6   :  { %17 = vsyncpa [#allocation4], 0 }
   0x7   :  { %19 = vsyncpa [#allocation4 + $0x1], 0 }
   0x8   :  { %20 = vsyncpa [#allocation9], 0 }
   0x9   :  { %22 = vsyncpa [#allocation9 + $0x1], 0 }
   0xa   :  { %23 = vsyncpa [#allocation12], 0 }
   0xb   :  { %25 = vsyncpa [#allocation12 + $0x1], 0  ;;  %s1380_s18 = smov 0   ;;  %s1382_s19 = smov 0  }
   0xc   :  { %s1384_s20 = smov 0   ;;  %s1386_s21 = smov 0  }
   0xd   :  { %s1388_s22 = smov 0   ;;  %s1390_s23 = smov 0  }
   0xe LB: > { %1990 = sst [smem:[#allocation18_spill]] %s1325_s20  ;;  %s1411_s24 = sadd.s32 4294967295, %s1337_s23   ;;  %s1337_s23 = sphi %s1390_s23, %s31_s23   ;;  %s1333_s22 = sphi %s1388_s22, %s2008_s22   ;;  %s1329_s21 = sphi %s1386_s21, %s2007_s21   ;;  %s1325_s20 = sphi %s1384_s20, %s2003_s20   ;;  %s1321_s19 = sphi %s1382_s19, %s2006_s19   ;;  %s1317_s18 = sphi %s1380_s18, %s2005_s18  }
   0xf   : > { %s1986_s25 = sadd.s32 4294967294, %s1337_s23   ;;  %s50_s26 = sadd.s32 1, %s1333_s22 }
  0x10   : > { %s61_s27 = sadd.s32 1, %s1325_s20  ;;  %p52_p0 = scmp.ge.s32.totalorder %s50_s26, 2 }
  0x11   : > { %p68_p1 = scmp.ne.s32.totalorder %s1325_s20, %s1321_s19  ;;  %p69_p2 = scmp.eq.s32.totalorder %s1337_s23, 0 }
  0x12   : > { %p74_p3 = scmp.ne.s32.totalorder %s1321_s19, %s1317_s18  ;;  %s2010_s26 = smov (%p52_p0, %s50_s26), 0 }
  0x13   : > { %1991 = sst [smem:[#allocation19_spill]] %s2010_s26  ;;  %p1423_p4 = por %p69_p2, %p68_p1 }
  0x14   : > { %p75_p5 = scmp.eq.s32.totalorder %s1411_s24, 0  ;;  %s56_s29 = ssub.s32 %s1333_s22, %s2010_s26 }
  0x15   : > { %p130_p6 = scmp.eq.s32.totalorder %s1411_s24, 1  ;;  %p59_p7 = scmp.eq.s32.totalorder %s56_s29, 0 }
  0x16   : > { %p1431_p8 = por %p75_p5, %p74_p3  ;;  %p136_p10 = scmp.eq.s32.totalorder %s1986_s25, 1 }
  0x17   : > { %p1435_p9 = por %p130_p6, %p68_p1  ;;  %p1008_p13 = scmp.lt.s32.totalorder %s1337_s23, 2 }
  0x18   : > { %s1442_s7 = scalar_select %p59_p7, %s1325_s20, %s61_s27  }
  0x19   : > { %p1444_p11 = por %p136_p10, %p74_p3  ;;  %s1451_s9 = sand.u32 1, %s1325_s20  }
  0x1a   : > { %1995 = sst [smem:[#allocation20_spill]] %s1442_s7  ;;  %s947_s10 = sshll.u32 %s1451_s9, 7 }
  0x1b   : > { %s972_s11 = sshll.u32 %s1333_s22, 11  ;;  %s1997_s0 = sld [smem:[#allocation21_spill]] }
  0x1c   : > { %s244_s15 = scalar_lea.vmem [#allocation2], %s947_s10  ;;  %p1460_p0 = pnand %p1008_p13, %p1423_p4 }
  0x1d   : > { %s254_s16 = sshll.u32 %s244_s15, 4  ;;  %p952_p1 = scmp.ge.s32.totalorder %s1337_s23, 1  ;;  %s255_s16 = int_to_ptr.vmem [resolvable:$true] %s254_s16 }
  0x1e   : > { %s241_s27 = scalar_lea.sflag [#allocation3], %s1451_s9  ;;  %p1113_p2 = pneg %p1460_p0 }
  0x1f   : > { %s1124_s29 = scalar_lea.vmem %s255_s16, 2048  ;;  %s1339_s10 = smov [#allocation2]  }
  0x20   : > { %p1125_p3 = scmp.ne.s32.totalorder %s255_s16, %s1124_s29 }
  0x21   : > { %s253_s14 = scalar_lea.hbm %s1997_s0, %s972_s11  ;;  %s1129_s11 = sshll.u32 %s1339_s10, 4  ;;  %s1130_s11 = int_to_ptr.vmem [resolvable:$false] %s1129_s11 }
  0x22   : > { %p1127_p5 = pnand %p1125_p3, %p1113_p2  ;;  %s1131_s28 = scalar_lea.vmem %s1130_s11, 4096 }
  0x23   : > { %p1132_p4 = scmp.lt.s32.totalorder %s255_s16, %s1130_s11  ;;  %p1133_p7 = scmp.lt.s32.totalorder %s1131_s28, %s1124_s29 }
  0x24   : > { %p1128_p6 = pneg %p1127_p5 }
  0x25   : > { %p1134_p10 = por %p1133_p7, %p1132_p4 }
  0x27   : > { %p1135_p13 = pnand %p1134_p10, %p1128_p6 }
  0x29   : > { %1138 = shalt.err (!%p1135_p13)
}
  0x2a   : > { %s1340_s12 = smov 128   ;;  %s1341_s13 = smov 8  }
  0x2b   : > { %991 = dma.hbm_to_vmem [thread:$0]  (!%p1460_p0), %s253_s14, 2048, %s255_s16, %s241_s27, %s1340_s12, %s1340_s12, %s1341_s13  }
  0x2c   : > { %p282_p3 = scmp.lt.s32.totalorder %s1337_s23, 3  ;;  %s950_s15 = sshll.u32 %s1451_s9, 3 }
  0x2d   : > { %s951_s10 = sshll.u32 %s1333_s22, 7  ;;  %s268_s0 = scalar_lea.vmem [#allocation5], %s950_s15 }
  0x2e   : > { %p1478_p5 = pnand %p952_p1, %p282_p3  ;;  %s275_s25 = scalar_lea.hbm %s1981_s1, %s951_s10 }
  0x2f   : > { %s277_s26 = sshll.u32 %s268_s0, 4  ;;  %s265_s7 = scalar_lea.sflag [#allocation6], %s1451_s9  ;;  %s278_s26 = int_to_ptr.vmem [resolvable:$true] %s277_s26 }
  0x30   : > { %s1152_s20 = scalar_lea.vmem %s278_s26, 128  ;;  %s1342_s14 = smov [#allocation5]  }
  0x31   : > { %p1153_p6 = scmp.ne.s32.totalorder %s278_s26, %s1152_s20  ;;  %s1157_s16 = sshll.u32 %s1342_s14, 4  ;;  %s1158_s16 = int_to_ptr.vmem [resolvable:$false] %s1157_s16 }
  0x32   : > { %s1159_s27 = scalar_lea.vmem %s1158_s16, 256  ;;  %p1160_p1 = scmp.lt.s32.totalorder %s278_s26, %s1158_s16 }
  0x33   : > { %p1155_p4 = pnand %p1153_p6, %p1113_p2  ;;  %p1161_p10 = scmp.lt.s32.totalorder %s1159_s27, %s1152_s20 }
  0x35   : > { %p1156_p7 = pneg %p1155_p4  ;;  %p1162_p13 = por %p1161_p10, %p1160_p1 }
  0x37   : > { %p1163_p3 = pnand %p1162_p13, %p1156_p7 }
  0x39   : > { %1166 = shalt.err (!%p1163_p3)
}
  0x3a   : > { %994 = dma.hbm_to_vmem [thread:$0]  (!%p1460_p0), %s275_s25, 128, %s278_s26, %s265_s7  }
  0x3b   : > { %286 = sbr.rel (%p1478_p5) target bundleno = 221 (0xdd), region = 28  ;;  %s1494_s0 = sand.u32 (!%p1478_p5), 1, %s1321_s19  }
  0x3c   : > { %s953_s9 = sshll.u32 (!%p1478_p5), %s1494_s0, 7  ;;  %s289_s12 = scalar_lea.sflag (!%p1478_p5), [#allocation3], %s1494_s0 }
  0x3d   : > { %s292_s13 = scalar_lea.vmem (!%p1478_p5), [#allocation2], %s953_s9 }
  0x40   : > { %1296 = dma.done.wait (%p1431_p8), %s289_s12, 2048  }
  0x41   : > { %1298 = vsyncadd (%p1431_p8), %s289_s12, 4294965248  ;;  %s954_s20 = sshll.u32 %s1494_s0, 3  ;;  %s298_s25 = scalar_lea.sflag [#allocation6], %s1494_s0 }
  0x42   : > { %s1506_s26 = scalar_lea.vmem [#allocation5], %s954_s20 }
  0x43   : > { %1300 = dma.done.wait (%p1431_p8), %s298_s25, 128  }
  0x44   : > { %1302 = vsyncadd (%p1431_p8), %s298_s25, 4294967168  ;;  %v1512_v0 = vld [vmem:[%s292_s13] sm:$0xff]  ;;  %v1514_v1 = vld [vmem:[%s292_s13 + $0x8] sm:$0xff]  ;;  %s1653_s30 = sshll.u32 %s1494_s0, 5  ;;  %s660_s17 = sand.u32 1, %s1411_s24  }
  0x45   : > { %v1516_v2 = vld [vmem:[%s292_s13 + $0x10] sm:$0xff]  ;;  %v1518_v3 = vld [vmem:[%s292_s13 + $0x18] sm:$0xff]  ;;  %v1520_v4 = vld [vmem:[%s292_s13 + $0x20] sm:$0xff]  ;;  %s1693_s7 = scalar_lea.vmem [#allocation10], %s1653_s30  ;;  %s1785_s15 = sshll.u32 %s1329_s21, 9 }
  0x46   : > { %v1522_v5 = vld [vmem:[%s292_s13 + $0x28] sm:$0xff]  ;;  %v1524_v6 = vld [vmem:[%s292_s13 + $0x30] sm:$0xff]  ;;  %v1526_v7 = vld [vmem:[%s292_s13 + $0x38] sm:$0xff]  ;;  %v409_v9 = vmax.f32 %v1512_v0, %v1520_v4  ;;  %s333_s10 = scalar_lea.vmem [#allocation8], %s1653_s30  ;;  %s719_s11 = sshll.u32 %s1693_s7, 4  ;;  %s1823_s11 = int_to_ptr.vmem [resolvable:$true] %s719_s11 }
  0x47   : > { %v1528_v8 = vld [vmem:[%s292_s13 + $0x40] sm:$0xff]  ;;  %v412_v10 = vmax.f32 %v1514_v1, %v1522_v5  ;;  %v1534_v11 = vld [vmem:[%s292_s13 + $0x48] sm:$0xff]  ;;  %v1536_v12 = vld [vmem:[%s292_s13 + $0x50] sm:$0xff]  ;;  %v415_v14 = vmax.f32 %v1516_v2, %v1524_v6  ;;  %v418_v15 = vmax.f32 %v1518_v3, %v1526_v7  ;;  %s702_s29 = sshll.u32 %s333_s10, 4  ;;  %s1801_s16 = scalar_lea.hbm %s1983_s3, %s1785_s15  ;;  %s1803_s29 = int_to_ptr.vmem [resolvable:$true] %s702_s29 }
  0x48   : > { %v1538_v13 = vld [vmem:[%s292_s13 + $0x58] sm:$0xff]  ;;  %v1544_v16 = vld [vmem:[%s292_s13 + $0x60] sm:$0xff]  ;;  %v1546_v17 = vld [vmem:[%s292_s13 + $0x68] sm:$0xff]  ;;  %v410_v19 = vmax.f32 %v409_v9, %v1528_v8  ;;  %s1821_s12 = scalar_lea.hbm %s1984_s4, %s1785_s15  ;;  %s1167_s25 = scalar_lea.vmem %s1803_s29, 512 }
  0x49   : > { %v1548_v18 = vld [vmem:[%s292_s13 + $0x70] sm:$0xff]  ;;  %v413_v20 = vmax.f32 %v412_v10, %v1534_v11  ;;  %v1552_v21 = vld [vmem:[%s292_s13 + $0x78] sm:$0xff]  ;;  %v416_v22 = vmax.f32 %v415_v14, %v1536_v12  ;;  %v419_v23 = vmax.f32 %v418_v15, %v1538_v13  ;;  %v388_v34 = vld [vmem:[%s1506_s26] sm:$0xff]  ;;  %v1343_v15 = vmov 0.0   ;;  %s1839_s13 = scalar_lea.sflag [#allocation9], %s660_s17  ;;  %p1168_p8 = scmp.ne.s32.totalorder %s1803_s29, %s1167_s25 }
  0x4a   : > { %v1557_v24 = vmax.f32 %v410_v19, %v1544_v16  ;;  %v1589_v45 = vunpack.c.0.s8 %v388_v34  ;;  %v1603_v56 = vunpack.c.1.s8 %v388_v34  ;;  %v1605_v57 = vunpack.c.2.s8 %v388_v34  ;;  %s1344_s26 = smov [#allocation8]  }
  0x4b   : > { %v1560_v25 = vmax.f32 %v413_v20, %v1546_v17  ;;  %v1563_v26 = vmax.f32 %v416_v22, %v1548_v18  ;;  %v1566_v27 = vmax.f32 %v419_v23, %v1552_v21  ;;  %v1607_v59 = vunpack.c.3.s8 %v388_v34  ;;  %p1169_p0 = pnand %p1168_p8, %p1435_p9 }
  0x4c   : > { %v421_v28 = vsub.f32 %v1512_v0, %v1557_v24  ;;  %v425_v32 = vsub.f32 %v1520_v4, %v1557_v24  ;;  %v429_v41 = vsub.f32 %v1528_v8, %v1557_v24  ;;  %v433_v49 = vsub.f32 %v1544_v16, %v1557_v24 }
  0x4d   : > { %v422_v29 = vsub.f32 %v1514_v1, %v1560_v25  ;;  %v423_v30 = vsub.f32 %v1516_v2, %v1563_v26  ;;  %v424_v31 = vsub.f32 %v1518_v3, %v1566_v27  ;;  %v426_v33 = vsub.f32 %v1522_v5, %v1560_v25  ;;  %p1170_p2 = pneg %p1169_p0 }
  0x4e   : > { %v427_v35 = vsub.f32 %v1524_v6, %v1563_v26  ;;  %v437_v36 = vmul.f32 1.442695, %v421_v28  ;;  %v428_v39 = vsub.f32 %v1526_v7, %v1566_v27  ;;  %v445_v42 = vmul.f32 1.442695, %v425_v32 }
  0x4f   : > { %v439_v37 = vmul.f32 1.442695, %v422_v29  ;;  %v441_v38 = vmul.f32 1.442695, %v423_v30  ;;  %v443_v40 = vmul.f32 1.442695, %v424_v31  ;;  %v430_v43 = vsub.f32 %v1534_v11, %v1560_v25 }
  0x50   : > { %1063 = vpow2.f32 %v437_v36  ;;  %v447_v44 = vmul.f32 1.442695, %v426_v33  ;;  %v431_v46 = vsub.f32 %v1536_v12, %v1563_v26  ;;  %v432_v47 = vsub.f32 %v1538_v13, %v1566_v27 }
  0x51   : > { %1065 = vpow2.f32 %v439_v37  ;;  %v449_v48 = vmul.f32 1.442695, %v427_v35  ;;  %v434_v50 = vsub.f32 %v1546_v17, %v1560_v25  ;;  %v451_v51 = vmul.f32 1.442695, %v428_v39 }
  0x52   : > { %1067 = vpow2.f32 %v441_v38  ;;  %v435_v52 = vsub.f32 %v1548_v18, %v1563_v26  ;;  %v436_v53 = vsub.f32 %v1552_v21, %v1566_v27  ;;  %v453_v54 = vmul.f32 1.442695, %v429_v41 }
  0x53   : > { %1069 = vpow2.f32 %v443_v40  ;;  %v455_v55 = vmul.f32 1.442695, %v430_v43  ;;  %v457_v58 = vmul.f32 1.442695, %v431_v46  ;;  %v459_v60 = vmul.f32 1.442695, %v432_v47 }
  0x54   : > { %1071 = vpow2.f32 %v445_v42  ;;  %v461_v61 = vmul.f32 1.442695, %v433_v49  ;;  %v463_v62 = vmul.f32 1.442695, %v434_v50  ;;  %v465_v63 = vmul.f32 1.442695, %v435_v52 }
  0x55   : > { %1073 = vpow2.f32 %v447_v44  ;;  %v467_v9 = vmul.f32 1.442695, %v436_v53  ;;  %vm393_vm0 = vcmp.eq.s32.totalorder %v1589_v45, 0  ;;  %vm394_vm1 = vcmp.eq.s32.totalorder %v1603_v56, 0 }
  0x56   : > { %1075 = vpow2.f32 %v449_v48  ;;  %vm395_vm2 = vcmp.eq.s32.totalorder %v1605_v57, 0  ;;  %vm396_vm3 = vcmp.eq.s32.totalorder %v1607_v59, 0  ;;  %vm397_vm4 = vcmp.eq.s32.totalorder %v1589_v45, 1 }
  0x57   : > { %1077 = vpow2.f32 %v451_v51  ;;  %vm398_vm5 = vcmp.eq.s32.totalorder %v1603_v56, 1  ;;  %vm399_vm6 = vcmp.eq.s32.totalorder %v1605_v57, 1  ;;  %vm400_vm7 = vcmp.eq.s32.totalorder %v1607_v59, 1 }
  0x58   : > { %1079 = vpow2.f32 %v453_v54  ;;  %vm401_vm8 = vcmp.eq.s32.totalorder %v1589_v45, 2  ;;  %vm402_vm9 = vcmp.eq.s32.totalorder %v1603_v56, 2  ;;  %vm403_vm10 = vcmp.eq.s32.totalorder %v1605_v57, 2 }
  0x59   : > { %1081 = vpow2.f32 %v455_v55  ;;  %vm404_vm11 = vcmp.eq.s32.totalorder %v1607_v59, 2  ;;  %vm405_vm12 = vcmp.eq.s32.totalorder %v1589_v45, 3  ;;  %vm406_vm13 = vcmp.eq.s32.totalorder %v1603_v56, 3 }
  0x5a   : > { %1083 = vpow2.f32 %v457_v58  ;;  %vm407_vm14 = vcmp.eq.s32.totalorder %v1605_v57, 3  ;;  %v569_v19 = vsel %vm393_vm0, 1.0, %v1343_v15  ;;  %v570_v20 = vsel %vm394_vm1, 1.0, %v1343_v15 }
  0x5b   : > { %1085 = vpow2.f32 %v459_v60  ;;  %v571_v22 = vsel %vm395_vm2, 1.0, %v1343_v15  ;;  %v572_v28 = vsel %vm396_vm3, 1.0, %v1343_v15  ;;  %v585_v29 = vadd.f32 %v570_v20, %v569_v19 }
  0x5c   : > { %1087 = vpow2.f32 %v461_v61  ;;  %v573_v30 = vsel %vm397_vm4, 1.0, %v1343_v15  ;;  %v574_v32 = vsel %vm398_vm5, 1.0, %v1343_v15  ;;  %v575_v33 = vsel %vm399_vm6, 1.0, %v1343_v15 }
  0x5d   : > { %v1621_v10 = vpop.eup %1063  ;;  %1089 = vpow2.f32 %v463_v62  ;;  %v576_v34 = vsel %vm400_vm7, 1.0, %v1343_v15  ;;  %v577_v35 = vsel %vm401_vm8, 1.0, %v1343_v15  ;;  %v586_v37 = vadd.f32 %v585_v29, %v571_v22 }
  0x5e   : > { %v1626_v14 = vpop.eup %1065  ;;  %1091 = vpow2.f32 %v465_v63  ;;  %v588_v38 = vadd.f32 %v574_v32, %v573_v30  ;;  %v578_v39 = vsel %vm402_vm9, 1.0, %v1343_v15  ;;  %v579_v40 = vsel %vm403_vm10, 1.0, %v1343_v15 }
  0x5f   : > { %v1634_v23 = vpop.eup %1067  ;;  %1093 = vpow2.f32 %v467_v9  ;;  %v580_v43 = vsel %vm404_vm11, 1.0, %v1343_v15  ;;  %v591_v44 = vadd.f32 %v578_v39, %v577_v35  ;;  %v581_v46 = vsel %vm405_vm12, 1.0, %v1343_v15 }
  0x60   : > { %v1640_v31 = vpop.eup %1069  ;;  %v587_v49 = vadd.f32 %v586_v37, %v572_v28  ;;  %v589_v50 = vadd.f32 %v588_v38, %v575_v33  ;;  %v582_v51 = vsel %vm406_vm13, 1.0, %v1343_v15  ;;  %vm408_vm15 = vcmp.eq.s32.totalorder %v1607_v59, 3 }
  0x61   : > { %v1650_v36 = vpop.eup %1071  ;;  %v592_v54 = vadd.f32 %v591_v44, %v579_v40  ;;  %v583_v55 = vsel %vm407_vm14, 1.0, %v1343_v15  ;;  %v594_v62 = vadd.f32 %v582_v51, %v581_v46  ;;  %v584_v20 = vsel %vm408_vm15, 1.0, %v1343_v15 }
  0x62   : > { %v1659_v41 = vpop.eup %1073  ;;  %v469_v42 = vadd.f32 %v1650_v36, %v1621_v10  ;;  %v590_v61 = vadd.f32 %v589_v50, %v576_v34  ;;  %601 = vst [vmem:[%s1693_s7] sm:$0xff] %v587_v49  ;;  %v618_v46 = vsel %vm394_vm1, %v1514_v1, 0.0  ;;  %v619_v49 = vsel %vm395_vm2, %v1516_v2, 0.0 }
  0x63   : > { %v1667_v47 = vpop.eup %1075  ;;  %v472_v48 = vadd.f32 %v1659_v41, %v1626_v14  ;;  %v593_v19 = vadd.f32 %v592_v54, %v580_v43  ;;  %v595_v29 = vadd.f32 %v594_v62, %v583_v55  ;;  %v617_v43 = vsel %vm393_vm0, %v1512_v0, 0.0 }
  0x64   : > { %v1673_v52 = vpop.eup %1077  ;;  %v475_v53 = vadd.f32 %v1667_v47, %v1634_v23  ;;  %602 = vst [vmem:[%s1693_s7 + $0x8] sm:$0xff] %v590_v61  ;;  %v622_v0 = vsel %vm398_vm5, %v1522_v5, 0.0  ;;  %v623_v50 = vsel %vm399_vm6, %v1524_v6, 0.0  ;;  %v620_v2 = vsel %vm396_vm3, %v1518_v3, 0.0 }
  0x65   : > { %v1680_v58 = vpop.eup %1079  ;;  %v478_v60 = vadd.f32 %v1673_v52, %v1640_v31  ;;  %v596_v15 = vadd.f32 %v595_v29, %v584_v20  ;;  %603 = vst [vmem:[%s1693_s7 + $0x10] sm:$0xff] %v593_v19  ;;  %v636_v51 = vadd.f32 %v622_v0, %v618_v46  ;;  %v624_v5 = vsel %vm400_vm7, %v1526_v7, 0.0 }
  0x66   : > { %v1684_v63 = vpop.eup %1081  ;;  %v470_v9 = vadd.f32 %v1680_v58, %v469_v42  ;;  %v626_v6 = vsel %vm402_vm9, %v1534_v11, 0.0  ;;  %v627_v54 = vsel %vm403_vm10, %v1536_v12, 0.0  ;;  %v628_v7 = vsel %vm404_vm11, %v1538_v13, 0.0 }
  0x67   : > { %v1689_v22 = vpop.eup %1083  ;;  %v473_v28 = vadd.f32 %v1684_v63, %v472_v48  ;;  %v621_v48 = vsel %vm397_vm4, %v1520_v4, 0.0  ;;  %604 = vst [vmem:[%s1693_s7 + $0x18] sm:$0xff] %v596_v15  ;;  %v625_v4 = vsel %vm401_vm8, %v1528_v8, 0.0  ;;  %v629_v8 = vsel %vm405_vm12, %v1544_v16, 0.0  ;;  %s1171_s7 = sshll.u32 %s1344_s26, 4  ;;  %s1172_s7 = int_to_ptr.vmem [resolvable:$false] %s1171_s7 }
  0x68   : > { %v1696_v30 = vpop.eup %1085  ;;  %v476_v32 = vadd.f32 %v1689_v22, %v475_v53  ;;  %v633_v1 = vadd.f32 %v621_v48, %v617_v43  ;;  %v639_v53 = vadd.f32 %v623_v50, %v619_v49  ;;  %v637_v61 = vadd.f32 %v636_v51, %v626_v6  ;;  %p1174_p5 = scmp.lt.s32.totalorder %s1803_s29, %s1172_s7 }
  0x69   : > { %v1088_v33 = vpop.eup %1087  ;;  %v479_v34 = vadd.f32 %v1696_v30, %v478_v60  ;;  %v642_v60 = vadd.f32 %v624_v5, %v620_v2  ;;  %v630_v11 = vsel %vm406_vm13, %v1546_v17, 0.0  ;;  %v631_v12 = vsel %vm407_vm14, %v1548_v18, 0.0 }
  0x6a   : > { %v1090_v35 = vpop.eup %1089  ;;  %v471_v37 = vadd.f32 %v1088_v33, %v470_v9  ;;  %v634_v55 = vadd.f32 %v633_v1, %v625_v4  ;;  %v640_v3 = vadd.f32 %v639_v53, %v627_v54  ;;  %v1751_v16 = vsel %vm408_vm15, %v1552_v21, 0.0 }
  0x6b   : > { %v1092_v38 = vpop.eup %1091  ;;  %v474_v39 = vadd.f32 %v1090_v35, %v473_v28  ;;  %v1755_v13 = vadd.f32 %v637_v61, %v630_v11  ;;  %v1759_v17 = vadd.f32 %v642_v60, %v628_v7 }
  0x6c   : > { %v1094_v40 = vpop.eup %1093  ;;  %v477_v42 = vadd.f32 %v1092_v38, %v476_v32  ;;  %1095 = vrcp.f32 %v471_v37  ;;  %v1753_v62 = vadd.f32 %v634_v55, %v629_v8  ;;  %v1757_v19 = vadd.f32 %v640_v3, %v631_v12 }
  0x6d   : > { %v480_v44 = vadd.f32 %v1094_v40, %v479_v34  ;;  %1097 = vrcp.f32 %v474_v39 }
  0x6e   : > { %1099 = vrcp.f32 %v477_v42 }
  0x6f   : > { %1101 = vrcp.f32 %v480_v44 }
  0x70   : > { %1103 = vlog2.f32 %v471_v37 }
  0x71   : > { %1105 = vlog2.f32 %v474_v39 }
  0x72   : > { %1107 = vlog2.f32 %v477_v42 }
  0x73   : > { %1109 = vlog2.f32 %v480_v44 }
  0x79   : > { %v1096_v9 = vpop.eup %1095 }
  0x7a   : > { %v1098_v20 = vpop.eup %1097  ;;  %v485_v18 = vmul.f32 %v1096_v9, %v1621_v10  ;;  %v489_v28 = vmul.f32 %v1096_v9, %v1650_v36  ;;  %v493_v29 = vmul.f32 %v1096_v9, %v1680_v58  ;;  %v497_v32 = vmul.f32 %v1096_v9, %v1088_v33 }
  0x7b   : > { %v1100_v21 = vpop.eup %1099  ;;  %v486_v34 = vmul.f32 %v1098_v20, %v1626_v14  ;;  %v490_v15 = vmul.f32 %v1098_v20, %v1659_v41  ;;  %v494_v37 = vmul.f32 %v1098_v20, %v1684_v63  ;;  %v498_v39 = vmul.f32 %v1098_v20, %v1090_v35 }
  0x7c   : > { %v1102_v42 = vpop.eup %1101  ;;  %v487_v43 = vmul.f32 %v1100_v21, %v1634_v23  ;;  %v491_v44 = vmul.f32 %v1100_v21, %v1667_v47  ;;  %v495_v10 = vmul.f32 %v1100_v21, %v1689_v22  ;;  %v499_v36 = vmul.f32 %v1100_v21, %v1092_v38 }
  0x7d   : > { %v488_v58 = vmul.f32 %v1102_v42, %v1640_v31  ;;  %v545_v33 = vadd.f32 %v486_v34, %v485_v18  ;;  %v492_v46 = vmul.f32 %v1102_v42, %v1673_v52  ;;  %v548_v14 = vadd.f32 %v490_v15, %v489_v28  ;;  %v1104_v5 = vpop.eup %1103 }
  0x7e   : > { %v496_v41 = vmul.f32 %v1102_v42, %v1696_v30  ;;  %v551_v48 = vadd.f32 %v494_v37, %v493_v29  ;;  %v500_v63 = vmul.f32 %v1102_v42, %v1094_v40  ;;  %v554_v35 = vadd.f32 %v498_v39, %v497_v32  ;;  %v1106_v55 = vpop.eup %1105 }
  0x7f   : > { %v546_v23 = vadd.f32 %v545_v33, %v487_v43  ;;  %v549_v49 = vadd.f32 %v548_v14, %v491_v44  ;;  %v505_v47 = vsel %vm393_vm0, %v485_v18, 0.0  ;;  %v506_v22 = vsel %vm394_vm1, %v486_v34, 0.0  ;;  %v1805_v61 = vpop.eup %1107 }
  0x80   : > { %v552_v31 = vadd.f32 %v551_v48, %v495_v10  ;;  %v555_v52 = vadd.f32 %v554_v35, %v499_v36  ;;  %v507_v30 = vsel %vm395_vm2, %v487_v43, 0.0  ;;  %v508_v38 = vsel %vm396_vm3, %v488_v58, 0.0  ;;  %v1825_v9 = vpop.eup %1109 }
  0x81   : > { %v547_v40 = vadd.f32 %v546_v23, %v488_v58  ;;  %v550_v0 = vadd.f32 %v549_v49, %v492_v46  ;;  %v521_v50 = vadd.f32 %v506_v22, %v505_v47  ;;  %v509_v1 = vsel %vm397_vm4, %v489_v28, 0.0 }
  0x82   : > { %v553_v51 = vadd.f32 %v552_v31, %v496_v41  ;;  %v556_v53 = vadd.f32 %v555_v52, %v500_v63  ;;  %v510_v4 = vsel %vm398_vm5, %v490_v15, 0.0  ;;  %v511_v2 = vsel %vm399_vm6, %v491_v44, 0.0 }
  0x83   : > { %v522_v6 = vadd.f32 %v521_v50, %v507_v30  ;;  %v512_v54 = vsel %vm400_vm7, %v492_v46, 0.0  ;;  %v524_v60 = vadd.f32 %v510_v4, %v509_v1  ;;  %v513_v8 = vsel %vm401_vm8, %v493_v29, 0.0  ;;  %561 = vst [vmem:[%s333_s10] sm:$0xff] %v547_v40  ;;  %562 = vst [vmem:[%s333_s10 + $0x8] sm:$0xff] %v550_v0 }
  0x84   : > { %v514_v7 = vsel %vm402_vm9, %v494_v37, 0.0  ;;  %v515_v11 = vsel %vm403_vm10, %v495_v10, 0.0  ;;  %v1815_v12 = vsel %vm404_vm11, %v496_v41, 0.0  ;;  %563 = vst [vmem:[%s333_s10 + $0x10] sm:$0xff] %v553_v51  ;;  %564 = vst [vmem:[%s333_s10 + $0x18] sm:$0xff] %v556_v53  ;;  %v517_v28 = vsel %vm405_vm12, %v497_v32, 0.0 }
  0x85   : > { %v1807_v3 = vadd.f32 %v522_v6, %v508_v38  ;;  %v525_v20 = vadd.f32 %v524_v60, %v511_v2  ;;  %v527_v18 = vadd.f32 %v514_v7, %v513_v8  ;;  %v518_v29 = vsel %vm406_vm13, %v498_v39, 0.0  ;;  %s1173_s10 = scalar_lea.vmem %s1172_s7, 1024 }
  0x86   : > { %v519_v21 = vsel %vm407_vm14, %v499_v36, 0.0  ;;  %v1835_v34 = vsel %vm408_vm15, %v500_v63, 0.0  ;;  %v530_v15 = vadd.f32 %v518_v29, %v517_v28  ;;  %p1175_p6 = scmp.lt.s32.totalorder %s1173_s10, %s1167_s25 }
  0x88   : > { %p1176_p4 = por %p1175_p6, %p1174_p5 }
  0x8a   : > { %p1177_p7 = pnand %p1176_p4, %p1170_p2 }
  0x8c   : > { %1180 = shalt.err (!%p1177_p7)
}
  0x8d   : > { %s1181_s24 = scalar_lea.hbm %s1801_s16, 512  ;;  %s1185_s14 = scalar_lea.hbm %s1983_s3, 1024 }
  0x8e   : > { %p1182_p1 = scmp.ne.s32.totalorder %s1801_s16, %s1181_s24  ;;  %p1186_p3 = scmp.lt.s32.totalorder %s1801_s16, %s1983_s3 }
  0x8f   : > { %p1187_p8 = scmp.lt.s32.totalorder %s1185_s14, %s1181_s24 }
  0x90   : > { %p1183_p10 = pnand %p1182_p1, %p1435_p9 }
  0x91   : > { %p1188_p0 = por %p1187_p8, %p1186_p3 }
  0x92   : > { %p1184_p13 = pneg %p1183_p10 }
  0x94   : > { %p1189_p2 = pnand %p1188_p0, %p1184_p13 }
  0x96   : > { %1192 = shalt.err (!%p1189_p2)
}
  0x97   : > { %s1345_s25 = smov 128   ;;  %s1346_s26 = smov 8   ;;  %v526_v45 = vadd.f32 %v525_v20, %v512_v54  ;;  %v528_v56 = vadd.f32 %v527_v18, %v515_v11  ;;  %v606_v57 = vmul.f32 0.6931472, %v1104_v5  ;;  %v608_v59 = vmul.f32 0.6931472, %v1106_v55 }
  0x98   : > { %981 = dma.vmem_to_hbm [thread:$0]  (%p1435_p9), %s1803_s29, 512, %s1801_s16, %s1839_s13, %s1345_s25, %s1345_s25, %s1346_s26  }
  0x99   : > { %s1193_s7 = scalar_lea.vmem %s1823_s11, 512  ;;  %s1347_s10 = smov [#allocation10]  }
  0x9a   : > { %p1194_p5 = scmp.ne.s32.totalorder %s1823_s11, %s1193_s7  ;;  %s1197_s24 = sshll.u32 %s1347_s10, 4  ;;  %s1198_s24 = int_to_ptr.vmem [resolvable:$false] %s1197_s24 }
  0x9b   : > { %s1199_s17 = scalar_lea.vmem %s1198_s24, 1024  ;;  %p1200_p7 = scmp.lt.s32.totalorder %s1823_s11, %s1198_s24 }
  0x9c   : > { %p1195_p6 = pnand %p1194_p5, %p1435_p9  ;;  %p1201_p1 = scmp.lt.s32.totalorder %s1199_s17, %s1193_s7 }
  0x9e   : > { %p1196_p4 = pneg %p1195_p6  ;;  %p1202_p10 = por %p1201_p1, %p1200_p7 }
  0xa0   : > { %p1203_p13 = pnand %p1202_p10, %p1196_p4 }
  0xa2   : > { %1206 = shalt.err (!%p1203_p13)
}
  0xa3   : > { %s1207_s29 = scalar_lea.hbm %s1821_s12, 512  ;;  %s1211_s14 = scalar_lea.hbm %s1984_s4, 1024 }
  0xa4   : > { %p1208_p3 = scmp.ne.s32.totalorder %s1821_s12, %s1207_s29  ;;  %p1212_p2 = scmp.lt.s32.totalorder %s1821_s12, %s1984_s4 }
  0xa5   : > { %p1213_p5 = scmp.lt.s32.totalorder %s1211_s14, %s1207_s29 }
  0xa6   : > { %p1209_p8 = pnand %p1208_p3, %p1435_p9 }
  0xa7   : > { %p1214_p6 = por %p1213_p5, %p1212_p2 }
  0xa8   : > { %p1210_p0 = pneg %p1209_p8 }
  0xaa   : > { %p1215_p4 = pnand %p1214_p6, %p1210_p0 }
  0xac   : > { %1218 = shalt.err (!%p1215_p4)
}
  0xad   : > { %982 = dma.vmem_to_hbm [thread:$0]  (%p1435_p9), %s1823_s11, 512, %s1821_s12, %s1839_s13, %s1345_s25, %s1345_s25, %s1346_s26   ;;  %v531_v32 = vadd.f32 %v530_v15, %v519_v21  ;;  %v610_v37 = vmul.f32 0.6931472, %v1805_v61  ;;  %v612_v39 = vmul.f32 0.6931472, %v1825_v9  ;;  %v644_v42 = vadd.f32 %v1759_v17, %v1751_v16 }
  0xae   : > { %s326_s7 = scalar_lea.vmem [#allocation7], %s1653_s30  ;;  %v529_v43 = vadd.f32 %v528_v56, %v1815_v12  ;;  %v613_v44 = vadd.f32 %v606_v57, %v1557_v24  ;;  %v614_v10 = vadd.f32 %v608_v59, %v1560_v25  ;;  %s1908_s13 = scalar_lea.hbm %s1982_s2, %s1785_s15 }
  0xaf   : > { %537 = vst [vmem:[%s326_s7] sm:$0xff] %v1807_v3  ;;  %s685_s11 = sshll.u32 %s326_s7, 4  ;;  %v532_v36 = vadd.f32 %v531_v32, %v1835_v34  ;;  %v615_v58 = vadd.f32 %v610_v37, %v1563_v26  ;;  %v616_v33 = vadd.f32 %v612_v39, %v1566_v27  ;;  %538 = vst [vmem:[%s326_s7 + $0x8] sm:$0xff] %v526_v45  ;;  %s656_s10 = scalar_lea.sflag [#allocation4], %s1494_s0  ;;  %s1910_s11 = int_to_ptr.vmem [resolvable:$true] %s685_s11 }
  0xb0   : > { %v645_v46 = vsub.f32 %v613_v44, %v1753_v62  ;;  %v646_v16 = vsub.f32 %v614_v10, %v1755_v13  ;;  %539 = vst [vmem:[%s326_s7 + $0x10] sm:$0xff] %v529_v43  ;;  %s1219_s24 = scalar_lea.vmem %s1910_s11, 512  ;;  %s1348_s17 = smov [#allocation7]  }
  0xb1   : > { %v647_v17 = vsub.f32 %v615_v58, %v1757_v19  ;;  %v648_v24 = vsub.f32 %v616_v33, %v644_v42  ;;  %540 = vst [vmem:[%s326_s7 + $0x18] sm:$0xff] %v532_v36  ;;  %p1220_p7 = scmp.ne.s32.totalorder %s1910_s11, %s1219_s24  ;;  %s1223_s29 = sshll.u32 %s1348_s17, 4  ;;  %s1224_s29 = int_to_ptr.vmem [resolvable:$false] %s1223_s29 }
  0xb2   : > { %v650_v25 = vadd.f32 %v646_v16, %v645_v46  ;;  %s1225_s15 = scalar_lea.vmem %s1224_s29, 1024  ;;  %p1226_p13 = scmp.lt.s32.totalorder %s1910_s11, %s1224_s29 }
  0xb3   : > { %p1221_p1 = pnand %p1220_p7, %p1435_p9  ;;  %p1227_p3 = scmp.lt.s32.totalorder %s1225_s15, %s1219_s24 }
  0xb4   : > { %v651_v26 = vadd.f32 %v650_v25, %v647_v17 }
  0xb5   : > { %p1222_p10 = pneg %p1221_p1  ;;  %p1228_p8 = por %p1227_p3, %p1226_p13 }
  0xb7   : > { %p1229_p0 = pnand %p1228_p8, %p1222_p10 }
  0xb9   : > { %1232 = shalt.err (!%p1229_p0)
}
  0xba   : > { %s1233_s16 = scalar_lea.hbm %s1908_s13, 512  ;;  %s1237_s27 = scalar_lea.hbm %s1982_s2, 1024 }
  0xbb   : > { %p1234_p2 = scmp.ne.s32.totalorder %s1908_s13, %s1233_s16  ;;  %p1238_p4 = scmp.lt.s32.totalorder %s1908_s13, %s1982_s2 }
  0xbc   : > { %p1239_p7 = scmp.lt.s32.totalorder %s1237_s27, %s1233_s16 }
  0xbd   : > { %p1235_p5 = pnand %p1234_p2, %p1435_p9 }
  0xbe   : > { %p1240_p1 = por %p1239_p7, %p1238_p4 }
  0xbf   : > { %p1236_p6 = pneg %p1235_p5 }
  0xc1   : > { %p1241_p10 = pnand %p1240_p1, %p1236_p6 }
  0xc3   : > { %1244 = shalt.err (!%p1241_p10)
}
  0xc4   : > { %980 = dma.vmem_to_hbm [thread:$0]  (%p1435_p9), %s1910_s11, 512, %s1908_s13, %s656_s10, %s1345_s25, %s1345_s25, %s1346_s26   ;;  %v652_v27 = vadd.f32 %v651_v26, %v648_v24 }
  0xc5   : > { %s969_s30 = sshll.u32 %s1329_s21, 7  ;;  %s347_s12 = scalar_lea.vmem [#allocation11], %s954_s20 }
  0xc6   : > { %s736_s24 = sshll.u32 %s347_s12, 4  ;;  %s734_s15 = scalar_lea.hbm %s1985_s5, %s969_s30  ;;  %654 = vst [vmem:[%s347_s12] sm:$0xff] %v652_v27  ;;  %s737_s24 = int_to_ptr.vmem [resolvable:$true] %s736_s24 }
  0xc7   : > { %s671_s16 = scalar_lea.sflag [#allocation12], %s1494_s0  ;;  %s1245_s28 = scalar_lea.vmem %s737_s24, 128 }
  0xc8   : > { %p1246_p13 = scmp.ne.s32.totalorder %s737_s24, %s1245_s28  ;;  %s1349_s14 = smov [#allocation11]  }
  0xc9   : > { %s1249_s27 = sshll.u32 %s1349_s14, 4  ;;  %s1250_s27 = int_to_ptr.vmem [resolvable:$false] %s1249_s27 }
  0xca   : > { %p1247_p3 = pnand %p1246_p13, %p1435_p9  ;;  %s1251_s21 = scalar_lea.vmem %s1250_s27, 256 }
  0xcb   : > { %p1252_p0 = scmp.lt.s32.totalorder %s737_s24, %s1250_s27  ;;  %p1253_p2 = scmp.lt.s32.totalorder %s1251_s21, %s1245_s28 }
  0xcc   : > { %p1248_p8 = pneg %p1247_p3 }
  0xcd   : > { %p1254_p5 = por %p1253_p2, %p1252_p0 }
  0xcf   : > { %p1255_p6 = pnand %p1254_p5, %p1248_p8 }
  0xd1   : > { %1258 = shalt.err (!%p1255_p6)
}
  0xd2   : > { %s1259_s20 = scalar_lea.hbm %s734_s15, 128  ;;  %s1263_s26 = scalar_lea.hbm %s1985_s5, 256 }
  0xd3   : > { %p1260_p4 = scmp.ne.s32.totalorder %s734_s15, %s1259_s20  ;;  %p1264_p10 = scmp.lt.s32.totalorder %s734_s15, %s1985_s5 }
  0xd4   : > { %p1265_p13 = scmp.lt.s32.totalorder %s1263_s26, %s1259_s20 }
  0xd5   : > { %p1261_p7 = pnand %p1260_p4, %p1435_p9 }
  0xd6   : > { %p1266_p3 = por %p1265_p13, %p1264_p10 }
  0xd7   : > { %p1262_p1 = pneg %p1261_p7 }
  0xd9   : > { %p1267_p12 = pnand %p1266_p3, %p1262_p1 }
  0xdb   : > { %1270 = shalt.err (!%p1267_p12)
}
  0xdc   : > { %983 = dma.vmem_to_hbm [thread:$0]  (%p1435_p9), %s737_s24, 128, %s734_s15, %s671_s16  }
  0xdd PF: > { %s748_s10 = sand.u32 1, %s1317_s18   ;;  %p2000_p8 = scmp.ge.s32.totalorder %s1337_s23, 2 }
  0xde   : > { %s749_s9 = scalar_lea.sflag [#allocation4], %s748_s10 }
  0xdf   : > { %p996_p0 = pnand %p2000_p8, %p1444_p11 }
  0xe1   : > { %p997_p2 = pneg %p996_p0 }
  0xe3   : > { %1304 = dma.done.wait (%p997_p2), %s749_s9, 512  }
  0xe4   : > { %1306 = vsyncadd (%p997_p2), %s749_s9, 4294966784  ;;  %s2001_s7 = sadd.s32 4294967294, %s1337_s23  }
  0xe5   : > { %s757_s30 = sand.u32 1, %s2001_s7  }
  0xe6   : > { %s758_s12 = scalar_lea.sflag [#allocation9], %s757_s30 }
  0xe7   : > { %1308 = dma.done.wait (%p997_p2), %s758_s12, 1024  }
  0xe8   : > { %1310 = vsyncadd (%p997_p2), %s758_s12, 4294966272  ;;  %s776_s6 = scalar_lea.sflag [#allocation12], %s748_s10 }
  0xe9   : > { %1312 = dma.done.wait (%p997_p2), %s776_s6, 128  }
  0xea   : > { %1314 = vsyncadd (%p997_p2), %s776_s6, 4294967168  ;;  %s31_s23 = sadd.s32 1, %s1337_s23   ;;  %s2002_s8 = sld [smem:[#allocation18_spill]] }
  0xeb   : > { %p28_p9 = scmp.ge.s32.totalorder %s31_s23, 4   ;;  %s2003_s20 = sld [smem:[#allocation20_spill]] }
  0xec   : > { %s2004_s24 = sld [smem:[#allocation19_spill]]  ;;  %s2005_s18 = smov %s1321_s19 }
  0xed   : > { %s2007_s21 = smov %s1333_s22 }
  0xee   :  { %30 = sbr.rel (!%p28_p9) target bundleno = 14 (0xe), region = 139 }
  0xf0   : > { %s2006_s19 = smov %s2002_s8 }
  0xf2   : > { %s2008_s22 = smov %s2004_s24 }
  0xf3   :  { %781 = vsyncpa [#allocation3], 1 }
  0xf4   :  { %783 = vsyncpa [#allocation3 + $0x1], 1 }
  0xf5   :  { %784 = vsyncpa [#allocation6], 1 }
  0xf6   :  { %786 = vsyncpa [#allocation6 + $0x1], 1 }
  0xf7   :  { %787 = vsyncpa [#allocation4], 1 }
  0xf8   :  { %789 = vsyncpa [#allocation4 + $0x1], 1 }
  0xf9   :  { %790 = vsyncpa [#allocation9], 1 }
  0xfa   :  { %792 = vsyncpa [#allocation9 + $0x1], 1 }
  0xfb   :  { %793 = vsyncpa [#allocation12], 1 }
  0xfc   :  { %795 = vsyncpa [#allocation12 + $0x1], 1 }

</bundles_post_ra>
